<compile_context>
chip_gen: v5e
topology: v5e:2x2
jax: 0.10.0
libtpu: 0.0.40
codegen_flags: <defaults>
</compile_context>

<pallas_src>
import functools

import jax
import jax.numpy as jnp
import numpy as np
from jax.experimental import pallas as pl
from jax.experimental.pallas import tpu as pltpu


def _weighted_onehot(coord, size):
    """Weighted bilinear one-hot over `size` grid rows for (1, TN) coords.

    Returns (size, TN) f32 with w_lo at floor(pos) and w_hi at floor(pos)+1;
    out-of-range corners never match the iota -> zeros padding for free.
    """
    tn = coord.shape[1]
    pos = (coord + 1.0) * (0.5 * (size - 1))          # align_corners=True
    low = jnp.floor(pos)
    w_hi = pos - low
    w_lo = 1.0 - w_hi
    idx = low.astype(jnp.int32)
    ids = jax.lax.broadcasted_iota(jnp.int32, (size, tn), 0)
    return (jnp.where(ids == idx, w_lo, 0.0)
            + jnp.where(ids == idx + 1, w_hi, 0.0))


def _tile_rows(mat, reps):
    """Tile a (rows, TN) matrix `reps` times along the row (sublane) axis."""
    if reps == 1:
        return mat
    rows, cols = mat.shape
    if rows % 8 == 0:
        # Layout-preserving collapse: broadcast over a new major dim + reshape.
        return jnp.broadcast_to(mat[None], (reps, rows, cols)).reshape(
            reps * rows, cols)
    return jnp.concatenate([mat] * reps, axis=0)


def _planegrid_kernel(coords_ref, slab_a_ref, slab_b_ref, sel_a_ref, sel_b_ref,
                      out_ref, *, rc, x_dim, y_dim, z_dim):
    x = coords_ref[0:1, :]        # (1, TN)
    y = coords_ref[1:2, :]
    z = coords_ref[2:3, :]

    # One weighted one-hot per axis, built once and reused:
    #   x -> rows of xy & xz;  y -> columns of xy and rows of yz;
    #   z -> columns of xz and yz.
    oh_x = _weighted_onehot(x, x_dim)     # (X, TN)
    oh_y = _weighted_onehot(y, y_dim)     # (Y, TN)
    oh_z = _weighted_onehot(z, z_dim)     # (Z, TN)

    pdt = slab_a_ref.dtype

    # ---- fused xy+xz: both contract K=X with the same row one-hot -----------
    interp_a = jnp.dot(slab_a_ref[...], oh_x.astype(pdt),
                       preferred_element_type=jnp.float32)    # (rc*(Y+Z), TN)
    colw_a = _tile_rows(jnp.concatenate([oh_y, oh_z], axis=0), rc)
    feat = jnp.dot(sel_a_ref[...], interp_a * colw_a,
                   preferred_element_type=jnp.float32)         # (rc, TN)

    # ---- yz plane ------------------------------------------------------------
    interp_b = jnp.dot(slab_b_ref[...], oh_y.astype(pdt),
                       preferred_element_type=jnp.float32)     # (rc*Z, TN)
    colw_b = _tile_rows(oh_z, rc)
    feat = feat + jnp.dot(sel_b_ref[...], interp_b * colw_b,
                          preferred_element_type=jnp.float32)

    out_ref[...] = feat


def plane_grid_forward(xyz, xy_plane, xz_plane, yz_plane, *, tn=1024, rc=None,
                       plane_dtype=jnp.float32):
    """Pallas implementation of PlaneGrid.forward.

    xyz:    (..., 3) query coordinates, used directly as grid_sample normalized
            coords (exactly as the PyTorch module does).
    planes: PyTorch-layout parameters (1, R, X, Y), (1, R, X, Z), (1, R, Y, Z).
    tn:     point-tile size (lanes); auto-capped by a VMEM estimate and shrunk
            so there are >= 2 tiles when possible (v7x megacore split).
    rc:     channels per grid step; default picks the largest block whose slabs
            fit comfortably in VMEM (must divide R; multiple of 8 if < R).
    plane_dtype: use jnp.bfloat16 in production on all generations (v5e/v6e/v7x)
            to halve slab DMA/VMEM at native MXU rate (~1e-3 relative error);
            the float32 default keeps this script's exact reference check.
    Returns (..., R) float32 features.
    """
    shape = xyz.shape[:-1]
    R = xy_plane.shape[1]
    if R <= 1:
        raise ValueError("PlaneGrid requires channels > 1 (as in the PyTorch module)")
    X, Y = xy_plane.shape[2], xy_plane.shape[3]
    Z = xz_plane.shape[3]
    assert xz_plane.shape[2] == X and yz_plane.shape[2] == Y and yz_plane.shape[3] == Z

    coords = xyz.reshape(-1, 3).astype(jnp.float32)
    N = coords.shape[0]

    itemsize = jnp.dtype(plane_dtype).itemsize

    def _pad_lane(n):                     # slab last dim maps to lanes
        return ((n + 127) // 128) * 128

    def _slab_vmem(rc_):                  # lane-padded VMEM of both slab blocks
        return (rc_ * (Y + Z) * _pad_lane(X) + rc_ * Z * _pad_lane(Y)) * itemsize

    # ---- channel-block selection: bounds slab residency (v7x: 64 MiB VMEM) ---
    if rc is None:
        rc = R
        # Halve (keeping rc a multiple of 8 that divides R) until the
        # double-buffered slab blocks sit comfortably under ~16 MiB.
        while rc > 8 and rc % 16 == 0 and 2 * _slab_vmem(rc) > (16 << 20):
            rc //= 2
    if R % rc != 0 or (rc != R and rc % 8 != 0):
        raise ValueError(f"invalid channel block rc={rc} for R={R}")

    # ---- point-tile selection -------------------------------------------------
    # Per-point f32 bytes of the in-kernel intermediates (one-hots, interp,
    # colw, weighted, output/coord tiles); used to cap TN against VMEM.
    per_point = 4 * (X + Y + Z + 3 * rc * (Y + Z) + 3 * rc * Z + 4 * rc + 6)
    tn_cap = max(128, ((24 << 20) // per_point) // 128 * 128)
    tn_eff = max(128, (min(int(tn), tn_cap) // 128) * 128)
    # Keep >= 2 point tiles when possible so both v7x TensorCores get work.
    half_up = max(128, (((N + 1) // 2) + 127) // 128 * 128)
    tn_eff = min(tn_eff, half_up)
    n_pad = pl.cdiv(N, tn_eff) * tn_eff

    # Points-on-lanes coordinates (3, n_pad); padded tail points are discarded.
    coords_t = jnp.zeros((3, n_pad), jnp.float32).at[:, :N].set(coords.T)

    # Slab layout: per channel r, rows are [Y columns of xy | Z columns of xz],
    # K (lane) axis = X -> one fused stage-1 matmul for both planes.
    xy_t = jnp.transpose(xy_plane[0], (0, 2, 1))        # (R, Y, X)
    xz_t = jnp.transpose(xz_plane[0], (0, 2, 1))        # (R, Z, X)
    yz_t = jnp.transpose(yz_plane[0], (0, 2, 1))        # (R, Z, Y)
    slab_a = jnp.concatenate([xy_t, xz_t], axis=1).reshape(R * (Y + Z), X)
    slab_a = slab_a.astype(plane_dtype)
    slab_b = yz_t.reshape(R * Z, Y).astype(plane_dtype)

    # Constant 0/1 per-channel selection matrices, built once at trace time.
    sel_a = jnp.asarray(np.kron(np.eye(rc, dtype=np.float32),
                                np.ones((1, Y + Z), np.float32)))   # (rc, rc*(Y+Z))
    sel_b = jnp.asarray(np.kron(np.eye(rc, dtype=np.float32),
                                np.ones((1, Z), np.float32)))       # (rc, rc*Z)

    kernel = functools.partial(_planegrid_kernel, rc=rc, x_dim=X, y_dim=Y, z_dim=Z)
    grid = (R // rc, n_pad // tn_eff)
    steps = grid[0] * grid[1]

    # Cost estimate matching the actual two-stage algorithm (advisory only).
    flops = steps * (2 * rc * (Y + Z) * X * tn_eff          # fused xy/xz stage 1
                     + 2 * rc * Z * Y * tn_eff              # yz stage 1
                     + 2 * rc * (Y + 2 * Z) * tn_eff        # stage-2 elementwise
                     + 2 * rc * rc * (Y + 2 * Z) * tn_eff)  # selection matmuls
    bytes_accessed = int(3 * n_pad * 4
                         + (R * (Y + Z) * _pad_lane(X) + R * Z * _pad_lane(Y)) * itemsize
                         + (rc * rc * (Y + Z) + rc * rc * Z) * 4
                         + R * n_pad * 4)
    cost = pl.CostEstimate(flops=int(flops), transcendentals=0,
                           bytes_accessed=bytes_accessed)

    # Explicit VMEM budget: slabs (worst-case 2 buffers) + constants +
    # double-buffered coord/out tiles + intermediates, with headroom.
    est = (2 * _slab_vmem(rc)
           + 2 * (rc * rc * (Y + Z) + rc * rc * Z) * 4
           + 2 * (3 + rc) * tn_eff * 4
           + per_point * tn_eff)
    vmem_limit = int(min(96 << 20, max(32 << 20, int(est * 1.5) + (4 << 20))))

    def _build(single_buffer_consts):
        def _const_spec(shape, imap):
            if single_buffer_consts:
                return pl.BlockSpec(shape, imap, pipeline_mode=pl.Buffered(1))
            return pl.BlockSpec(shape, imap)

        return pl.pallas_call(
            kernel,
            out_shape=jax.ShapeDtypeStruct((R, n_pad), jnp.float32),
            grid_spec=pltpu.PrefetchScalarGridSpec(
                num_scalar_prefetch=0,
                grid=grid,                                            # (chan blk, pt tile)
                in_specs=[
                    pl.BlockSpec((3, tn_eff), lambda c, i: (0, i)),        # coords
                    _const_spec((rc * (Y + Z), X), lambda c, i: (c, 0)),   # xy|xz slab
                    _const_spec((rc * Z, Y), lambda c, i: (c, 0)),         # yz slab
                    _const_spec((rc, rc * (Y + Z)), lambda c, i: (0, 0)),  # sel_a
                    _const_spec((rc, rc * Z), lambda c, i: (0, 0)),        # sel_b
                ],
                out_specs=pl.BlockSpec((rc, tn_eff), lambda c, i: (c, i)),  # lane-dense
            ),
            compiler_params=pltpu.CompilerParams(
                dimension_semantics=("parallel", "parallel"),
                vmem_limit_bytes=vmem_limit),
            cost_estimate=cost,
        )

    args = (coords_t, slab_a, slab_b, sel_a, sel_b)
    try:
        out = _build(True)(*args)
    except Exception:
        # pipeline_mode=pl.Buffered(1) single-buffering of the constant-index
        # inputs is unavailable on this JAX build; fall back to the default
        # double-buffering (already accounted for in vmem_limit).
        out = _build(False)(*args)

    return out.T[:N].reshape(*shape, R)


# ------------------------- pure-JAX reference --------------------------------
def _grid_sample_ref(plane, gy, gx):
    # plane: (R, H, W); gy indexes H, gx indexes W; returns (N, R).
    R, H, W = plane.shape
    iy = (gy + 1.0) * 0.5 * (H - 1)
    ix = (gx + 1.0) * 0.5 * (W - 1)
    iy0 = jnp.floor(iy)
    ix0 = jnp.floor(ix)
    iy1 = iy0 + 1.0
    ix1 = ix0 + 1.0
    wy1 = iy - iy0
    wy0 = 1.0 - wy1
    wx1 = ix - ix0
    wx0 = 1.0 - wx1

    def g(iyc, ixc):
        valid = (iyc >= 0) & (iyc <= H - 1) & (ixc >= 0) & (ixc <= W - 1)
        iyi = jnp.clip(iyc, 0, H - 1).astype(jnp.int32)
        ixi = jnp.clip(ixc, 0, W - 1).astype(jnp.int32)
        v = plane[:, iyi, ixi]                        # (R, N)
        return jnp.where(valid[None, :], v, 0.0)

    out = (g(iy0, ix0) * (wy0 * wx0)[None]
           + g(iy0, ix1) * (wy0 * wx1)[None]
           + g(iy1, ix0) * (wy1 * wx0)[None]
           + g(iy1, ix1) * (wy1 * wx1)[None])
    return out.T


# TODO(synk): total_variation_add_grad is a training-time in-place grad op
# (loss.backward()); it is not part of the forward pass and is not implemented.

if __name__ == "__main__":
    key = jax.random.PRNGKey(0)
    k1, k2, k3, k4 = jax.random.split(key, 4)

    channels = 4                     # R (must be > 1, per the module)
    world_size = (8, 8, 8)
    config = {"factor": 2}           # self.scale
    scale = config["factor"]
    X, Y, Z = (s * scale for s in world_size)   # 16, 16, 16

    # Parameters: normal(mean=0, std=0.01), shapes exactly as in __init__.
    xy_plane = 0.01 * jax.random.normal(k1, (1, channels, X, Y), jnp.float32)
    xz_plane = 0.01 * jax.random.normal(k2, (1, channels, X, Z), jnp.float32)
    yz_plane = 0.01 * jax.random.normal(k3, (1, channels, Y, Z), jnp.float32)

    # Query coordinates (forward treats them directly as normalized coords);
    # slightly outside [-1, 1] to exercise the zeros padding path.
    xyz = jax.random.uniform(k4, (2, 100, 3), jnp.float32,
                             minval=-1.1, maxval=1.1)

    out = plane_grid_forward(xyz, xy_plane, xz_plane, yz_plane)
    out = jax.block_until_ready(out)
    assert out.shape == (2, 100, channels)

    # Cross-check against a pure-JAX reference of the PyTorch semantics.
    c = xyz.reshape(-1, 3)
    ref = (_grid_sample_ref(xy_plane[0], c[:, 0], c[:, 1])
           + _grid_sample_ref(xz_plane[0], c[:, 0], c[:, 2])
           + _grid_sample_ref(yz_plane[0], c[:, 1], c[:, 2]))
    ref = ref.reshape(2, 100, channels)
    np.testing.assert_allclose(np.asarray(out), np.asarray(ref),
                               rtol=1e-5, atol=1e-5)

    print("KERNEL_OK")
</pallas_src>

<mosaic_0001>
module attributes {stable_mosaic.version = 11 : i64} {
  func.func @_planegrid_kernel(%arg0: i32, %arg1: i32, %arg2: memref<3x128xf32, #tpu.memory_space<vmem>>, %arg3: memref<128x16xf32, #tpu.memory_space<vmem>>, %arg4: memref<64x16xf32, #tpu.memory_space<vmem>>, %arg5: memref<4x128xf32, #tpu.memory_space<vmem>>, %arg6: memref<4x64xf32, #tpu.memory_space<vmem>>, %arg7: memref<4x128xf32, #tpu.memory_space<vmem>>) attributes {dimension_semantics = [#tpu.dimension_semantics<parallel>, #tpu.dimension_semantics<parallel>], iteration_bounds = array<i64: 1, 2>, scalar_prefetch = 0 : i64, scratch_operands = 0 : i64, tpu.core_type = #tpu.core_type<tc>, window_params = [{transform_indices = @transform_0, window_bounds = array<i64: 3, 128>}, {pipeline_mode = #tpu.pipeline_mode<synchronous>, transform_indices = @transform_1, window_bounds = array<i64: 128, 16>}, {pipeline_mode = #tpu.pipeline_mode<synchronous>, transform_indices = @transform_2, window_bounds = array<i64: 64, 16>}, {pipeline_mode = #tpu.pipeline_mode<synchronous>, transform_indices = @transform_3, window_bounds = array<i64: 4, 128>}, {pipeline_mode = #tpu.pipeline_mode<synchronous>, transform_indices = @transform_4, window_bounds = array<i64: 4, 64>}, {transform_indices = @transform_5, window_bounds = array<i64: 4, 128>}]} {
    %c0 = arith.constant 0 : index
    %c0_0 = arith.constant 0 : index
    %0 = vector.load %arg2[%c0, %c0_0] : memref<3x128xf32, #tpu.memory_space<vmem>>, vector<1x128xf32>
    %c1 = arith.constant 1 : index
    %c0_1 = arith.constant 0 : index
    %1 = vector.load %arg2[%c1, %c0_1] : memref<3x128xf32, #tpu.memory_space<vmem>>, vector<1x128xf32>
    %c2 = arith.constant 2 : index
    %c0_2 = arith.constant 0 : index
    %2 = vector.load %arg2[%c2, %c0_2] : memref<3x128xf32, #tpu.memory_space<vmem>>, vector<1x128xf32>
    %cst = arith.constant 1.000000e+00 : f32
    %3 = vector.broadcast %cst : f32 to vector<1x128xf32>
    %4 = arith.addf %0, %3 : vector<1x128xf32>
    %cst_3 = arith.constant 7.500000e+00 : f32
    %5 = vector.broadcast %cst_3 : f32 to vector<1x128xf32>
    %6 = arith.mulf %4, %5 : vector<1x128xf32>
    %7 = math.floor %6 : vector<1x128xf32>
    %8 = arith.subf %6, %7 : vector<1x128xf32>
    %cst_4 = arith.constant 1.000000e+00 : f32
    %9 = vector.broadcast %cst_4 : f32 to vector<1x128xf32>
    %10 = arith.subf %9, %8 : vector<1x128xf32>
    %11 = arith.fptosi %7 : vector<1x128xf32> to vector<1x128xi32>
    %12 = tpu.iota {dimensions = array<i32: 0>} : vector<16x128xi32>
    %13 = vector.broadcast %11 : vector<1x128xi32> to vector<16x128xi32>
    %14 = arith.cmpi eq, %12, %13 : vector<16x128xi32>
    %cst_5 = arith.constant 0.000000e+00 : f32
    %15 = vector.shape_cast %10 : vector<1x128xf32> to vector<1x128xf32>
    %16 = vector.broadcast %15 : vector<1x128xf32> to vector<16x128xf32>
    %17 = vector.broadcast %cst_5 : f32 to vector<16x128xf32>
    %18 = arith.select %14, %16, %17 : vector<16x128xi1>, vector<16x128xf32>
    %c1_i32 = arith.constant 1 : i32
    %19 = vector.broadcast %c1_i32 : i32 to vector<1x128xi32>
    %20 = arith.addi %11, %19 : vector<1x128xi32>
    %21 = vector.broadcast %20 : vector<1x128xi32> to vector<16x128xi32>
    %22 = arith.cmpi eq, %12, %21 : vector<16x128xi32>
    %cst_6 = arith.constant 0.000000e+00 : f32
    %23 = vector.shape_cast %8 : vector<1x128xf32> to vector<1x128xf32>
    %24 = vector.broadcast %23 : vector<1x128xf32> to vector<16x128xf32>
    %25 = vector.broadcast %cst_6 : f32 to vector<16x128xf32>
    %26 = arith.select %22, %24, %25 : vector<16x128xi1>, vector<16x128xf32>
    %27 = arith.addf %18, %26 : vector<16x128xf32>
    %cst_7 = arith.constant 1.000000e+00 : f32
    %28 = vector.broadcast %cst_7 : f32 to vector<1x128xf32>
    %29 = arith.addf %1, %28 : vector<1x128xf32>
    %cst_8 = arith.constant 7.500000e+00 : f32
    %30 = vector.broadcast %cst_8 : f32 to vector<1x128xf32>
    %31 = arith.mulf %29, %30 : vector<1x128xf32>
    %32 = math.floor %31 : vector<1x128xf32>
    %33 = arith.subf %31, %32 : vector<1x128xf32>
    %cst_9 = arith.constant 1.000000e+00 : f32
    %34 = vector.broadcast %cst_9 : f32 to vector<1x128xf32>
    %35 = arith.subf %34, %33 : vector<1x128xf32>
    %36 = arith.fptosi %32 : vector<1x128xf32> to vector<1x128xi32>
    %37 = tpu.iota {dimensions = array<i32: 0>} : vector<16x128xi32>
    %38 = vector.broadcast %36 : vector<1x128xi32> to vector<16x128xi32>
    %39 = arith.cmpi eq, %37, %38 : vector<16x128xi32>
    %cst_10 = arith.constant 0.000000e+00 : f32
    %40 = vector.shape_cast %35 : vector<1x128xf32> to vector<1x128xf32>
    %41 = vector.broadcast %40 : vector<1x128xf32> to vector<16x128xf32>
    %42 = vector.broadcast %cst_10 : f32 to vector<16x128xf32>
    %43 = arith.select %39, %41, %42 : vector<16x128xi1>, vector<16x128xf32>
    %c1_i32_11 = arith.constant 1 : i32
    %44 = vector.broadcast %c1_i32_11 : i32 to vector<1x128xi32>
    %45 = arith.addi %36, %44 : vector<1x128xi32>
    %46 = vector.broadcast %45 : vector<1x128xi32> to vector<16x128xi32>
    %47 = arith.cmpi eq, %37, %46 : vector<16x128xi32>
    %cst_12 = arith.constant 0.000000e+00 : f32
    %48 = vector.shape_cast %33 : vector<1x128xf32> to vector<1x128xf32>
    %49 = vector.broadcast %48 : vector<1x128xf32> to vector<16x128xf32>
    %50 = vector.broadcast %cst_12 : f32 to vector<16x128xf32>
    %51 = arith.select %47, %49, %50 : vector<16x128xi1>, vector<16x128xf32>
    %52 = arith.addf %43, %51 : vector<16x128xf32>
    %cst_13 = arith.constant 1.000000e+00 : f32
    %53 = vector.broadcast %cst_13 : f32 to vector<1x128xf32>
    %54 = arith.addf %2, %53 : vector<1x128xf32>
    %cst_14 = arith.constant 7.500000e+00 : f32
    %55 = vector.broadcast %cst_14 : f32 to vector<1x128xf32>
    %56 = arith.mulf %54, %55 : vector<1x128xf32>
    %57 = math.floor %56 : vector<1x128xf32>
    %58 = arith.subf %56, %57 : vector<1x128xf32>
    %cst_15 = arith.constant 1.000000e+00 : f32
    %59 = vector.broadcast %cst_15 : f32 to vector<1x128xf32>
    %60 = arith.subf %59, %58 : vector<1x128xf32>
    %61 = arith.fptosi %57 : vector<1x128xf32> to vector<1x128xi32>
    %62 = tpu.iota {dimensions = array<i32: 0>} : vector<16x128xi32>
    %63 = vector.broadcast %61 : vector<1x128xi32> to vector<16x128xi32>
    %64 = arith.cmpi eq, %62, %63 : vector<16x128xi32>
    %cst_16 = arith.constant 0.000000e+00 : f32
    %65 = vector.shape_cast %60 : vector<1x128xf32> to vector<1x128xf32>
    %66 = vector.broadcast %65 : vector<1x128xf32> to vector<16x128xf32>
    %67 = vector.broadcast %cst_16 : f32 to vector<16x128xf32>
    %68 = arith.select %64, %66, %67 : vector<16x128xi1>, vector<16x128xf32>
    %c1_i32_17 = arith.constant 1 : i32
    %69 = vector.broadcast %c1_i32_17 : i32 to vector<1x128xi32>
    %70 = arith.addi %61, %69 : vector<1x128xi32>
    %71 = vector.broadcast %70 : vector<1x128xi32> to vector<16x128xi32>
    %72 = arith.cmpi eq, %62, %71 : vector<16x128xi32>
    %cst_18 = arith.constant 0.000000e+00 : f32
    %73 = vector.shape_cast %58 : vector<1x128xf32> to vector<1x128xf32>
    %74 = vector.broadcast %73 : vector<1x128xf32> to vector<16x128xf32>
    %75 = vector.broadcast %cst_18 : f32 to vector<16x128xf32>
    %76 = arith.select %72, %74, %75 : vector<16x128xi1>, vector<16x128xf32>
    %77 = arith.addf %68, %76 : vector<16x128xf32>
    %c0_19 = arith.constant 0 : index
    %c0_20 = arith.constant 0 : index
    %78 = vector.load %arg3[%c0_19, %c0_20] : memref<128x16xf32, #tpu.memory_space<vmem>>, vector<128x16xf32>
    %cst_21 = arith.constant dense<0.000000e+00> : vector<128x128xf32>
    %79 = tpu.matmul %78, %27, %cst_21 {dimension_numbers = #tpu.dot_dimension_numbers<[1], [0], [0], [1], [0, 0, 1, 1], [], []>} : vector<128x16xf32>, vector<16x128xf32>, vector<128x128xf32> -> vector<128x128xf32>
    %80 = tpu.concatenate %52, %77 in 0 : vector<16x128xf32>, vector<16x128xf32> -> vector<32x128xf32>
    %81 = vector.shape_cast %80 : vector<32x128xf32> to vector<1x32x128xf32>
    %82 = vector.shape_cast %81 : vector<1x32x128xf32> to vector<1x32x128xf32>
    %83 = vector.broadcast %82 : vector<1x32x128xf32> to vector<4x32x128xf32>
    %84 = vector.shape_cast %83 : vector<4x32x128xf32> to vector<128x128xf32>
    %c0_22 = arith.constant 0 : index
    %c0_23 = arith.constant 0 : index
    %85 = vector.load %arg5[%c0_22, %c0_23] : memref<4x128xf32, #tpu.memory_space<vmem>>, vector<4x128xf32>
    %86 = arith.mulf %79, %84 : vector<128x128xf32>
    %cst_24 = arith.constant dense<0.000000e+00> : vector<4x128xf32>
    %87 = tpu.matmul %85, %86, %cst_24 {dimension_numbers = #tpu.dot_dimension_numbers<[1], [0], [0], [1], [0, 0, 1, 1], [], []>} : vector<4x128xf32>, vector<128x128xf32>, vector<4x128xf32> -> vector<4x128xf32>
    %c0_25 = arith.constant 0 : index
    %c0_26 = arith.constant 0 : index
    %88 = vector.load %arg4[%c0_25, %c0_26] : memref<64x16xf32, #tpu.memory_space<vmem>>, vector<64x16xf32>
    %cst_27 = arith.constant dense<0.000000e+00> : vector<64x128xf32>
    %89 = tpu.matmul %88, %52, %cst_27 {dimension_numbers = #tpu.dot_dimension_numbers<[1], [0], [0], [1], [0, 0, 1, 1], [], []>} : vector<64x16xf32>, vector<16x128xf32>, vector<64x128xf32> -> vector<64x128xf32>
    %90 = vector.shape_cast %77 : vector<16x128xf32> to vector<1x16x128xf32>
    %91 = vector.shape_cast %90 : vector<1x16x128xf32> to vector<1x16x128xf32>
    %92 = vector.broadcast %91 : vector<1x16x128xf32> to vector<4x16x128xf32>
    %93 = vector.shape_cast %92 : vector<4x16x128xf32> to vector<64x128xf32>
    %c0_28 = arith.constant 0 : index
    %c0_29 = arith.constant 0 : index
    %94 = vector.load %arg6[%c0_28, %c0_29] : memref<4x64xf32, #tpu.memory_space<vmem>>, vector<4x64xf32>
    %95 = arith.mulf %89, %93 : vector<64x128xf32>
    %cst_30 = arith.constant dense<0.000000e+00> : vector<4x128xf32>
    %96 = tpu.matmul %94, %95, %cst_30 {dimension_numbers = #tpu.dot_dimension_numbers<[1], [0], [0], [1], [0, 0, 1, 1], [], []>} : vector<4x64xf32>, vector<64x128xf32>, vector<4x128xf32> -> vector<4x128xf32>
    %97 = arith.addf %87, %96 : vector<4x128xf32>
    %c0_31 = arith.constant 0 : index
    %c0_32 = arith.constant 0 : index
    %98 = vector.load %arg7[%c0_31, %c0_32] : memref<4x128xf32, #tpu.memory_space<vmem>>, vector<4x128xf32>
    tpu.vector_store %arg7[%c0_31, %c0_32], %97 {strides = array<i32>} : memref<4x128xf32, #tpu.memory_space<vmem>>, vector<4x128xf32>,
    return
  }
  func.func @transform_0(%arg0: i32, %arg1: i32) -> (i32, i32) {
    %c0_i32 = arith.constant 0 : i32
    %c0_i32_0 = arith.constant 0 : i32
    return %c0_i32, %arg1 : i32, i32
  }
  func.func @transform_1(%arg0: i32, %arg1: i32) -> (i32, i32) {
    %c0_i32 = arith.constant 0 : i32
    %c0_i32_0 = arith.constant 0 : i32
    return %arg0, %c0_i32 : i32, i32
  }
  func.func @transform_2(%arg0: i32, %arg1: i32) -> (i32, i32) {
    %c0_i32 = arith.constant 0 : i32
    %c0_i32_0 = arith.constant 0 : i32
    return %arg0, %c0_i32 : i32, i32
  }
  func.func @transform_3(%arg0: i32, %arg1: i32) -> (i32, i32) {
    %c0_i32 = arith.constant 0 : i32
    %c0_i32_0 = arith.constant 0 : i32
    %c0_i32_1 = arith.constant 0 : i32
    return %c0_i32, %c0_i32_0 : i32, i32
  }
  func.func @transform_4(%arg0: i32, %arg1: i32) -> (i32, i32) {
    %c0_i32 = arith.constant 0 : i32
    %c0_i32_0 = arith.constant 0 : i32
    %c0_i32_1 = arith.constant 0 : i32
    return %c0_i32, %c0_i32_0 : i32, i32
  }
  func.func @transform_5(%arg0: i32, %arg1: i32) -> (i32, i32) {
    %c0_i32 = arith.constant 0 : i32
    return %arg0, %arg1 : i32, i32
  }
}

module attributes {stable_mosaic.version = 11 : i64} {
  func.func @_planegrid_kernel(%arg0: i32, %arg1: i32, %arg2: memref<3x128xf32, #tpu.memory_space<vmem>>, %arg3: memref<128x16xf32, #tpu.memory_space<vmem>>, %arg4: memref<64x16xf32, #tpu.memory_space<vmem>>, %arg5: memref<4x128xf32, #tpu.memory_space<vmem>>, %arg6: memref<4x64xf32, #tpu.memory_space<vmem>>, %arg7: memref<4x128xf32, #tpu.memory_space<vmem>>) attributes {dimension_semantics = [#tpu.dimension_semantics<parallel>, #tpu.dimension_semantics<parallel>], iteration_bounds = array<i64: 1, 2>, scalar_prefetch = 0 : i64, scratch_operands = 0 : i64, tpu.core_type = #tpu.core_type<tc>, window_params = [{transform_indices = @transform_0, window_bounds = array<i64: 3, 128>}, {transform_indices = @transform_1, window_bounds = array<i64: 128, 16>}, {transform_indices = @transform_2, window_bounds = array<i64: 64, 16>}, {pipeline_mode = #tpu.pipeline_mode<synchronous>, transform_indices = @transform_3, window_bounds = array<i64: 4, 128>}, {pipeline_mode = #tpu.pipeline_mode<synchronous>, transform_indices = @transform_4, window_bounds = array<i64: 4, 64>}, {transform_indices = @transform_5, window_bounds = array<i64: 4, 128>}]} {
    %c0 = arith.constant 0 : index
    %c0_0 = arith.constant 0 : index
    %0 = vector.load %arg2[%c0, %c0_0] : memref<3x128xf32, #tpu.memory_space<vmem>>, vector<1x128xf32>
    %c1 = arith.constant 1 : index
    %c0_1 = arith.constant 0 : index
    %1 = vector.load %arg2[%c1, %c0_1] : memref<3x128xf32, #tpu.memory_space<vmem>>, vector<1x128xf32>
    %c2 = arith.constant 2 : index
    %c0_2 = arith.constant 0 : index
    %2 = vector.load %arg2[%c2, %c0_2] : memref<3x128xf32, #tpu.memory_space<vmem>>, vector<1x128xf32>
    %cst = arith.constant 1.000000e+00 : f32
    %3 = vector.broadcast %cst : f32 to vector<1x128xf32>
    %4 = arith.addf %0, %3 : vector<1x128xf32>
    %cst_3 = arith.constant 7.500000e+00 : f32
    %5 = vector.broadcast %cst_3 : f32 to vector<1x128xf32>
    %6 = arith.mulf %4, %5 : vector<1x128xf32>
    %7 = math.floor %6 : vector<1x128xf32>
    %8 = arith.subf %6, %7 : vector<1x128xf32>
    %cst_4 = arith.constant 1.000000e+00 : f32
    %9 = vector.broadcast %cst_4 : f32 to vector<1x128xf32>
    %10 = arith.subf %9, %8 : vector<1x128xf32>
    %11 = arith.fptosi %7 : vector<1x128xf32> to vector<1x128xi32>
    %12 = tpu.iota {dimensions = array<i32: 0>} : vector<16x128xi32>
    %13 = vector.broadcast %11 : vector<1x128xi32> to vector<16x128xi32>
    %14 = arith.cmpi eq, %12, %13 : vector<16x128xi32>
    %cst_5 = arith.constant 0.000000e+00 : f32
    %15 = vector.shape_cast %10 : vector<1x128xf32> to vector<1x128xf32>
    %16 = vector.broadcast %15 : vector<1x128xf32> to vector<16x128xf32>
    %17 = vector.broadcast %cst_5 : f32 to vector<16x128xf32>
    %18 = arith.select %14, %16, %17 : vector<16x128xi1>, vector<16x128xf32>
    %c1_i32 = arith.constant 1 : i32
    %19 = vector.broadcast %c1_i32 : i32 to vector<1x128xi32>
    %20 = arith.addi %11, %19 : vector<1x128xi32>
    %21 = vector.broadcast %20 : vector<1x128xi32> to vector<16x128xi32>
    %22 = arith.cmpi eq, %12, %21 : vector<16x128xi32>
    %cst_6 = arith.constant 0.000000e+00 : f32
    %23 = vector.shape_cast %8 : vector<1x128xf32> to vector<1x128xf32>
    %24 = vector.broadcast %23 : vector<1x128xf32> to vector<16x128xf32>
    %25 = vector.broadcast %cst_6 : f32 to vector<16x128xf32>
    %26 = arith.select %22, %24, %25 : vector<16x128xi1>, vector<16x128xf32>
    %27 = arith.addf %18, %26 : vector<16x128xf32>
    %cst_7 = arith.constant 1.000000e+00 : f32
    %28 = vector.broadcast %cst_7 : f32 to vector<1x128xf32>
    %29 = arith.addf %1, %28 : vector<1x128xf32>
    %cst_8 = arith.constant 7.500000e+00 : f32
    %30 = vector.broadcast %cst_8 : f32 to vector<1x128xf32>
    %31 = arith.mulf %29, %30 : vector<1x128xf32>
    %32 = math.floor %31 : vector<1x128xf32>
    %33 = arith.subf %31, %32 : vector<1x128xf32>
    %cst_9 = arith.constant 1.000000e+00 : f32
    %34 = vector.broadcast %cst_9 : f32 to vector<1x128xf32>
    %35 = arith.subf %34, %33 : vector<1x128xf32>
    %36 = arith.fptosi %32 : vector<1x128xf32> to vector<1x128xi32>
    %37 = tpu.iota {dimensions = array<i32: 0>} : vector<16x128xi32>
    %38 = vector.broadcast %36 : vector<1x128xi32> to vector<16x128xi32>
    %39 = arith.cmpi eq, %37, %38 : vector<16x128xi32>
    %cst_10 = arith.constant 0.000000e+00 : f32
    %40 = vector.shape_cast %35 : vector<1x128xf32> to vector<1x128xf32>
    %41 = vector.broadcast %40 : vector<1x128xf32> to vector<16x128xf32>
    %42 = vector.broadcast %cst_10 : f32 to vector<16x128xf32>
    %43 = arith.select %39, %41, %42 : vector<16x128xi1>, vector<16x128xf32>
    %c1_i32_11 = arith.constant 1 : i32
    %44 = vector.broadcast %c1_i32_11 : i32 to vector<1x128xi32>
    %45 = arith.addi %36, %44 : vector<1x128xi32>
    %46 = vector.broadcast %45 : vector<1x128xi32> to vector<16x128xi32>
    %47 = arith.cmpi eq, %37, %46 : vector<16x128xi32>
    %cst_12 = arith.constant 0.000000e+00 : f32
    %48 = vector.shape_cast %33 : vector<1x128xf32> to vector<1x128xf32>
    %49 = vector.broadcast %48 : vector<1x128xf32> to vector<16x128xf32>
    %50 = vector.broadcast %cst_12 : f32 to vector<16x128xf32>
    %51 = arith.select %47, %49, %50 : vector<16x128xi1>, vector<16x128xf32>
    %52 = arith.addf %43, %51 : vector<16x128xf32>
    %cst_13 = arith.constant 1.000000e+00 : f32
    %53 = vector.broadcast %cst_13 : f32 to vector<1x128xf32>
    %54 = arith.addf %2, %53 : vector<1x128xf32>
    %cst_14 = arith.constant 7.500000e+00 : f32
    %55 = vector.broadcast %cst_14 : f32 to vector<1x128xf32>
    %56 = arith.mulf %54, %55 : vector<1x128xf32>
    %57 = math.floor %56 : vector<1x128xf32>
    %58 = arith.subf %56, %57 : vector<1x128xf32>
    %cst_15 = arith.constant 1.000000e+00 : f32
    %59 = vector.broadcast %cst_15 : f32 to vector<1x128xf32>
    %60 = arith.subf %59, %58 : vector<1x128xf32>
    %61 = arith.fptosi %57 : vector<1x128xf32> to vector<1x128xi32>
    %62 = tpu.iota {dimensions = array<i32: 0>} : vector<16x128xi32>
    %63 = vector.broadcast %61 : vector<1x128xi32> to vector<16x128xi32>
    %64 = arith.cmpi eq, %62, %63 : vector<16x128xi32>
    %cst_16 = arith.constant 0.000000e+00 : f32
    %65 = vector.shape_cast %60 : vector<1x128xf32> to vector<1x128xf32>
    %66 = vector.broadcast %65 : vector<1x128xf32> to vector<16x128xf32>
    %67 = vector.broadcast %cst_16 : f32 to vector<16x128xf32>
    %68 = arith.select %64, %66, %67 : vector<16x128xi1>, vector<16x128xf32>
    %c1_i32_17 = arith.constant 1 : i32
    %69 = vector.broadcast %c1_i32_17 : i32 to vector<1x128xi32>
    %70 = arith.addi %61, %69 : vector<1x128xi32>
    %71 = vector.broadcast %70 : vector<1x128xi32> to vector<16x128xi32>
    %72 = arith.cmpi eq, %62, %71 : vector<16x128xi32>
    %cst_18 = arith.constant 0.000000e+00 : f32
    %73 = vector.shape_cast %58 : vector<1x128xf32> to vector<1x128xf32>
    %74 = vector.broadcast %73 : vector<1x128xf32> to vector<16x128xf32>
    %75 = vector.broadcast %cst_18 : f32 to vector<16x128xf32>
    %76 = arith.select %72, %74, %75 : vector<16x128xi1>, vector<16x128xf32>
    %77 = arith.addf %68, %76 : vector<16x128xf32>
    %c0_19 = arith.constant 0 : index
    %c0_20 = arith.constant 0 : index
    %78 = vector.load %arg3[%c0_19, %c0_20] : memref<128x16xf32, #tpu.memory_space<vmem>>, vector<128x16xf32>
    %cst_21 = arith.constant dense<0.000000e+00> : vector<128x128xf32>
    %79 = tpu.matmul %78, %27, %cst_21 {dimension_numbers = #tpu.dot_dimension_numbers<[1], [0], [0], [1], [0, 0, 1, 1], [], []>} : vector<128x16xf32>, vector<16x128xf32>, vector<128x128xf32> -> vector<128x128xf32>
    %80 = tpu.concatenate %52, %77 in 0 : vector<16x128xf32>, vector<16x128xf32> -> vector<32x128xf32>
    %81 = vector.shape_cast %80 : vector<32x128xf32> to vector<1x32x128xf32>
    %82 = vector.shape_cast %81 : vector<1x32x128xf32> to vector<1x32x128xf32>
    %83 = vector.broadcast %82 : vector<1x32x128xf32> to vector<4x32x128xf32>
    %84 = vector.shape_cast %83 : vector<4x32x128xf32> to vector<128x128xf32>
    %c0_22 = arith.constant 0 : index
    %c0_23 = arith.constant 0 : index
    %85 = vector.load %arg5[%c0_22, %c0_23] : memref<4x128xf32, #tpu.memory_space<vmem>>, vector<4x128xf32>
    %86 = arith.mulf %79, %84 : vector<128x128xf32>
    %cst_24 = arith.constant dense<0.000000e+00> : vector<4x128xf32>
    %87 = tpu.matmul %85, %86, %cst_24 {dimension_numbers = #tpu.dot_dimension_numbers<[1], [0], [0], [1], [0, 0, 1, 1], [], []>} : vector<4x128xf32>, vector<128x128xf32>, vector<4x128xf32> -> vector<4x128xf32>
    %c0_25 = arith.constant 0 : index
    %c0_26 = arith.constant 0 : index
    %88 = vector.load %arg4[%c0_25, %c0_26] : memref<64x16xf32, #tpu.memory_space<vmem>>, vector<64x16xf32>
    %cst_27 = arith.constant dense<0.000000e+00> : vector<64x128xf32>
    %89 = tpu.matmul %88, %52, %cst_27 {dimension_numbers = #tpu.dot_dimension_numbers<[1], [0], [0], [1], [0, 0, 1, 1], [], []>} : vector<64x16xf32>, vector<16x128xf32>, vector<64x128xf32> -> vector<64x128xf32>
    %90 = vector.shape_cast %77 : vector<16x128xf32> to vector<1x16x128xf32>
    %91 = vector.shape_cast %90 : vector<1x16x128xf32> to vector<1x16x128xf32>
    %92 = vector.broadcast %91 : vector<1x16x128xf32> to vector<4x16x128xf32>
    %93 = vector.shape_cast %92 : vector<4x16x128xf32> to vector<64x128xf32>
    %c0_28 = arith.constant 0 : index
    %c0_29 = arith.constant 0 : index
    %94 = vector.load %arg6[%c0_28, %c0_29] : memref<4x64xf32, #tpu.memory_space<vmem>>, vector<4x64xf32>
    %95 = arith.mulf %89, %93 : vector<64x128xf32>
    %cst_30 = arith.constant dense<0.000000e+00> : vector<4x128xf32>
    %96 = tpu.matmul %94, %95, %cst_30 {dimension_numbers = #tpu.dot_dimension_numbers<[1], [0], [0], [1], [0, 0, 1, 1], [], []>} : vector<4x64xf32>, vector<64x128xf32>, vector<4x128xf32> -> vector<4x128xf32>
    %97 = arith.addf %87, %96 : vector<4x128xf32>
    %c0_31 = arith.constant 0 : index
    %c0_32 = arith.constant 0 : index
    %98 = vector.load %arg7[%c0_31, %c0_32] : memref<4x128xf32, #tpu.memory_space<vmem>>, vector<4x128xf32>
    tpu.vector_store %arg7[%c0_31, %c0_32], %97 {strides = array<i32>} : memref<4x128xf32, #tpu.memory_space<vmem>>, vector<4x128xf32>,
    return
  }
  func.func @transform_0(%arg0: i32, %arg1: i32) -> (i32, i32) {
    %c0_i32 = arith.constant 0 : i32
    %c0_i32_0 = arith.constant 0 : i32
    return %c0_i32, %arg1 : i32, i32
  }
  func.func @transform_1(%arg0: i32, %arg1: i32) -> (i32, i32) {
    %c0_i32 = arith.constant 0 : i32
    %c0_i32_0 = arith.constant 0 : i32
    return %arg0, %c0_i32 : i32, i32
  }
  func.func @transform_2(%arg0: i32, %arg1: i32) -> (i32, i32) {
    %c0_i32 = arith.constant 0 : i32
    %c0_i32_0 = arith.constant 0 : i32
    return %arg0, %c0_i32 : i32, i32
  }
  func.func @transform_3(%arg0: i32, %arg1: i32) -> (i32, i32) {
    %c0_i32 = arith.constant 0 : i32
    %c0_i32_0 = arith.constant 0 : i32
    %c0_i32_1 = arith.constant 0 : i32
    return %c0_i32, %c0_i32_0 : i32, i32
  }
  func.func @transform_4(%arg0: i32, %arg1: i32) -> (i32, i32) {
    %c0_i32 = arith.constant 0 : i32
    %c0_i32_0 = arith.constant 0 : i32
    %c0_i32_1 = arith.constant 0 : i32
    return %c0_i32, %c0_i32_0 : i32, i32
  }
  func.func @transform_5(%arg0: i32, %arg1: i32) -> (i32, i32) {
    %c0_i32 = arith.constant 0 : i32
    return %arg0, %arg1 : i32, i32
  }
}

</mosaic_0001>

<bundles_post_ra>
// kernel: tpu_custom_call.1
= control target key start
LH: loop header
LB: loop body
LE: loop exit
PB: predicated region body
PF: predicated region fallthrough
CT: control target
= control target key end

     0   :  { %10 = vsyncpa [#allocation3], 0  ;;  %s1217_s0 = inlined_call_operand.vmem [shape: f32[3,256], index: 0, kind: input, shape index: {}]   ;;  %s1218_s1 = inlined_call_operand.vmem [shape: f32[128,16], index: 1, kind: input, shape index: {}]   ;;  %s1219_s2 = inlined_call_operand.vmem [shape: f32[64,16], index: 2, kind: input, shape index: {}]   ;;  %s1220_s3 = inlined_call_operand.vmem [shape: f32[4,128], index: 3, kind: input, shape index: {}]   ;;  %s1221_s4 = inlined_call_operand.vmem [shape: f32[4,64], index: 4, kind: input, shape index: {}]   ;;  %s1222_s5 = inlined_call_operand.hbm [shape: f32[4,256], index: 5, kind: output, shape index: {}]  }
   0x1   :  { %12 = vsyncpa [#allocation3 + $0x1], 0  ;;  %s951_s18 = smov 0   ;;  %s953_s19 = smov 0  }
   0x2   :  { %s955_s20 = smov 0   ;;  %s957_s21 = smov 0  }
   0x3   :  { %s959_s22 = smov 0   ;;  %s961_s23 = smov 0  }
   0x4 LB: > { %s738_s24 = sadd.s32 4294967295, %s919_s23   ;;  %s739_s25 = sadd.s32 4294967294, %s919_s23   ;;  %s919_s23 = sphi %s961_s23, %s18_s23   ;;  %s915_s22 = sphi %s959_s22, %s1235_s22   ;;  %s911_s21 = sphi %s957_s21, %s1234_s21   ;;  %s907_s20 = sphi %s955_s20, %s1233_s20   ;;  %s903_s19 = sphi %s953_s19, %s1232_s19   ;;  %s899_s18 = sphi %s951_s18, %s1231_s18  }
   0x5   : > { %s27_s26 = sadd.s32 1, %s915_s22  ;;  %s159_s27 = sadd.s32 1, %s907_s20 }
   0x6   : > { %p28_p0 = scmp.ge.s32.totalorder %s27_s26, 2  ;;  %p169_p1 = scmp.ne.s32.totalorder %s907_s20, %s903_s19 }
   0x7   : > { %p170_p2 = scmp.eq.s32.totalorder %s738_s24, 1  ;;  %p175_p3 = scmp.ne.s32.totalorder %s903_s19, %s899_s18 }
   0x8   : > { %s1237_s26 = smov (%p28_p0, %s27_s26), 0  ;;  %p176_p5 = scmp.eq.s32.totalorder %s739_s25, 1 }
   0x9   : > { %p991_p4 = por %p170_p2, %p169_p1  ;;  %s155_s29 = ssub.s32 %s915_s22, %s1237_s26 }
   0xa   : > { %p744_p6 = scmp.ge.s32.totalorder %s919_s23, 1  ;;  %p157_p7 = scmp.eq.s32.totalorder %s155_s29, 0 }
   0xb   : > { %p998_p8 = por %p176_p5, %p175_p3  ;;  %p225_p9 = scmp.lt.s32.totalorder %s919_s23, 3 }
   0xc   : > { %s1004_s6 = scalar_select %p157_p7, %s907_s20, %s159_s27  }
   0xd   : > { %p226_p10 = pnand %p744_p6, %p225_p9 }
   0xe   : > { %p262_p11 = scmp.lt.s32.totalorder (!%p226_p10), %s911_s21, 1  ;;  %s259_s25 = sand.u32 (!%p226_p10), 1, %s903_s19  }
   0xf   : > { %229 = sbr.rel (%p226_p10) target bundleno = 388 (0x184), region = 40  ;;  %s745_s27 = sshll.u32 (!%p226_p10), %s259_s25, 2 }
  0x10   : > { %s773_s29 = sshll.u32 (!%p226_p10), %s911_s21, 2  ;;  %s261_s10 = scalar_lea.vmem (!%p226_p10), [#allocation2], %s745_s27 }
  0x11   : > { %s634_s9 = scalar_lea.hbm (!%p226_p10), %s1222_s5, %s773_s29  ;;  %s622_s13 = scalar_lea.sflag (!%p226_p10), [#allocation3], %s259_s25 }
  0x12   : > { %s638_s12 = sshll.u32 (!%p226_p10), %s634_s9, 4  ;;  %s861_s17 = scalar_lea.hbm (!%p226_p10), %s1222_s5, 8  ;;  %s639_s12 = int_to_ptr.hbm [resolvable:$true] %s638_s12 }
  0x13   : > { %s855_s14 = sshra.s32 (!%p226_p10), %s639_s12, 4  ;;  %s856_s14 = int_to_ptr.hbm [resolvable:$true] %s855_s14 }
  0x14   : > { %s263_s7 = scalar_select %p262_p11, %s911_s21, 1  ;;  %v287_v0 = vlaneseq  ;;  %v357_v56 = vld [vmem:[%s1218_s1 + $0x50] sm:$0xff]  ;;  %vm363_vm10 = vcmask 130048   ;;  %v347_v57 = vld [vmem:[%s1218_s1] sm:$0xff]  ;;  %v358_v63 = vld [vmem:[%s1218_s1 + $0x58] sm:$0xff]  ;;  %vm576_vm13 = vcmask 523264  }
  0x15   : > { %v494_v62 = vld [vmem:[%s1219_s2] sm:$0xff]  ;;  %s857_s15 = scalar_lea.hbm %s856_s14, 4  ;;  %p862_p1 = scmp.lt.s32.totalorder %s856_s14, %s1222_s5 }
  0x16   : > { %s746_s8 = sshll.u32 %s263_s7, 2  ;;  %v1011_v7 = vshrl.u32 %v287_v0, 7  ;;  %v348_v0 = vld [vmem:[%s1218_s1 + $0x8] sm:$0xff]  ;;  %p858_p12 = scmp.ne.s32.totalorder %s856_s14, %s857_s15 }
  0x17   : > { %s265_s11 = scalar_lea.vmem %s1217_s0, %s746_s8  ;;  %p863_p2 = scmp.lt.s32.totalorder %s861_s17, %s857_s15 }
  0x18   : > { %v278_v1 = vld [vmem:[%s265_s11] sm:$0x1]  ;;  %v279_v2 = vld [vmem:[%s265_s11 + $0x1] sm:$0x1]  ;;  %v280_v3 = vld [vmem:[%s265_s11 + $0x2] sm:$0x1]  ;;  %p859_p13 = pnand %p858_p12, %p991_p4 }
  0x19   : > { %v281_v4 = vadd.f32 1.0, %v278_v1  ;;  %v305_v5 = vadd.f32 1.0, %v279_v2  ;;  %v326_v6 = vadd.f32 1.0, %v280_v3  ;;  %v289_v14 = vadd.s32 8, %v1011_v7  ;;  %v495_v1 = vld [vmem:[%s1219_s2 + $0x8] sm:$0xff]  ;;  %v359_v2 = vld [vmem:[%s1218_s1 + $0x60] sm:$0xff]  ;;  %p864_p3 = por %p863_p2, %p862_p1 }
  0x1a   : > { %v349_v3 = vld [vmem:[%s1218_s1 + $0x10] sm:$0xff]  ;;  %s636_s11 = sshll.u32 %s261_s10, 4  ;;  %p860_p0 = pneg %p859_p13  ;;  %s637_s11 = int_to_ptr.vmem [resolvable:$true] %s636_s11 }
  0x1b   : > { %v282_v8 = vmul.f32 7.5, %v281_v4  ;;  %v306_v9 = vmul.f32 7.5, %v305_v5  ;;  %v327_v10 = vmul.f32 7.5, %v326_v6  ;;  %v355_v4 = vld [vmem:[%s1218_s1 + $0x40] sm:$0xff]  ;;  %v496_v5 = vld [vmem:[%s1219_s2 + $0x10] sm:$0xff]  ;;  %v360_v6 = vld [vmem:[%s1218_s1 + $0x68] sm:$0xff] }
  0x1c   : > { %p865_p5 = pnand %p864_p3, %p860_p0 }
  0x1d   : > { %v283_v11 = vfloor.f32 %v282_v8  ;;  %v328_v12 = vfloor.f32 %v327_v10  ;;  %v307_v13 = vfloor.f32 %v306_v9 }
  0x1f   : > { %v284_v15 = vsub.f32 %v282_v8, %v283_v11  ;;  %v781_v16 = vcvt.f32.s32 %v283_v11  ;;  %v329_v17 = vsub.f32 %v327_v10, %v328_v12  ;;  %v785_v18 = vcvt.f32.s32 %v328_v12  ;;  %v356_v8 = vld [vmem:[%s1218_s1 + $0x48] sm:$0xff]  ;;  %v361_v10 = vld [vmem:[%s1218_s1 + $0x70] sm:$0xff]  ;;  %v351_v11 = vld [vmem:[%s1218_s1 + $0x20] sm:$0xff] }
  0x20   : > { %v308_v19 = vsub.f32 %v306_v9, %v307_v13  ;;  %v783_v20 = vcvt.f32.s32 %v307_v13  ;;  %v497_v9 = vld [vmem:[%s1219_s2 + $0x18] sm:$0xff]  ;;  %v498_v12 = vld [vmem:[%s1219_s2 + $0x20] sm:$0xff] }
  0x21   : > { %v285_v21 = vsub.f32 1.0, %v284_v15  ;;  %v290_v22 = vperm.slane %v781_v16, 0  ;;  %v296_v23 = vadd.s32 1, %v781_v16  ;;  %v300_v24 = vperm.slane %v284_v15, 0  ;;  %v362_v13 = vld [vmem:[%s1218_s1 + $0x78] sm:$0xff]  ;;  %v499_v15 = vld [vmem:[%s1219_s2 + $0x28] sm:$0xff] }
  0x22   : > { %v330_v25 = vsub.f32 1.0, %v329_v17  ;;  %v332_v26 = vperm.slane %v785_v18, 0  ;;  %v338_v27 = vadd.s32 1, %v785_v18  ;;  %v342_v28 = vperm.slane %v329_v17, 0  ;;  %v353_v16 = vld [vmem:[%s1218_s1 + $0x30] sm:$0xff]  ;;  %v354_v18 = vld [vmem:[%s1218_s1 + $0x38] sm:$0xff] }
  0x23   : > { %vm292_vm0 = vcmp.eq.s32.totalorder %v289_v14, %v290_v22  ;;  %v293_v29 = vperm.slane %v285_v21, 0  ;;  %v297_v30 = vperm.slane %v296_v23, 0  ;;  %v309_v31 = vsub.f32 1.0, %v308_v19  ;;  %v500_v17 = vld [vmem:[%s1219_s2 + $0x30] sm:$0xff] }
  0x24   : > { %vm1015_vm1 = vcmp.eq.s32.totalorder %v1011_v7, %v332_v26  ;;  %vm1019_vm2 = vcmp.eq.s32.totalorder %v289_v14, %v332_v26  ;;  %v335_v34 = vperm.slane %v330_v25, 0  ;;  %v339_v35 = vperm.slane %v338_v27, 0 }
  0x25   : > { %v295_v36 = vsel %vm292_vm0, %v293_v29, 0.0  ;;  %vm299_vm3 = vcmp.eq.s32.totalorder %v289_v14, %v297_v30  ;;  %v311_v37 = vperm.slane %v783_v20, 0  ;;  %v314_v43 = vperm.slane %v309_v31, 0 }
  0x26   : > { %v302_v38 = vsel %vm299_vm3, %v300_v24, 0.0  ;;  %v336_v39 = vsel %vm1015_vm1, %v335_v34, 0.0  ;;  %v337_v40 = vsel %vm1019_vm2, %v335_v34, 0.0  ;;  %vm340_vm4 = vcmp.eq.s32.totalorder %v1011_v7, %v339_v35 }
  0x27   : > { %v304_v41 = vadd.f32 %v302_v38, %v295_v36  ;;  %vm341_vm5 = vcmp.eq.s32.totalorder %v289_v14, %v339_v35  ;;  %v343_v42 = vsel %vm340_vm4, %v342_v28, 0.0  ;;  %vm1030_vm6 = vcmp.eq.s32.totalorder %v289_v14, %v311_v37 }
  0x28   : > { %v344_v44 = vsel %vm341_vm5, %v342_v28, 0.0  ;;  %v1028_v45 = vadd.f32 %v343_v42, %v336_v39  ;;  %v317_v47 = vadd.s32 1, %v783_v20  ;;  %v321_v49 = vperm.slane %v308_v19, 0  ;;  %v501_v19 = vld [vmem:[%s1219_s2 + $0x38] sm:$0xff] }
  0x29   : > { %v1034_v48 = vadd.f32 %v344_v44, %v337_v40  ;;  %777 = vmatpush.msra.mxu3 %v304_v41  ;;  %vm291_vm7 = vcmp.eq.s32.totalorder %v1011_v7, %v290_v22  ;;  %vm298_vm8 = vcmp.eq.s32.totalorder %v1011_v7, %v297_v30  ;;  %426 = vmatpush.msra.mxu0 %v304_v41  ;;  %v316_v53 = vsel %vm1030_vm6, %v314_v43, 0.0 }
  0x2a   : > { %v318_v50 = vperm.slane %v317_v47, 0  ;;  %v294_v51 = vsel %vm291_vm7, %v293_v29, 0.0  ;;  %v301_v52 = vsel %vm298_vm8, %v300_v24, 0.0  ;;  %vm312_vm9 = vcmp.eq.s32.totalorder %v1011_v7, %v311_v37  ;;  %776 = vmatpush.msra.mxu2 %v304_v41 }
  0x2b   : > { %v303_v54 = vadd.f32 %v301_v52, %v294_v51  ;;  %v315_v55 = vsel %vm312_vm9, %v314_v43, 0.0 }
  0x2c   : > { %vm320_vm11 = vcmp.eq.s32.totalorder %v289_v14, %v318_v50  ;;  %vm319_vm12 = vcmp.eq.s32.totalorder %v1011_v7, %v318_v50  ;;  %v350_v7 = vld [vmem:[%s1218_s1 + $0x18] sm:$0xff]  ;;  %v352_v14 = vld [vmem:[%s1218_s1 + $0x28] sm:$0xff] }
  0x2d   : > { %v323_v58 = vsel %vm320_vm11, %v321_v49, 0.0  ;;  %779 = vmatpush.msra.mxu3 %v303_v54  ;;  %v322_v59 = vsel %vm319_vm12, %v321_v49, 0.0  ;;  %427 = vmatpush.msra.mxu0 %v303_v54 }
  0x2e   : > { %v1048_v60 = vadd.f32 %v323_v58, %v316_v53  ;;  %v1050_v61 = vadd.f32 %v322_v59, %v315_v55  ;;  %757 = vmatmul.msk.f32.vlgmr.msra.gmra.mxu3 %vm363_vm10, %v357_v56  ;;  %747 = vmatmul.msk.f32.vlgmr.msra.gmra.mxu0 %vm363_vm10, %v347_v57 }
  0x2f   : > { %778 = vmatpush.msra.mxu2 %v303_v54 }
  0x30   : > { %540 = vmatpush.msra.mxu1 %v1048_v60  ;;  %755 = vmatmul.msk.f32.vlgmr.msra.gmra.mxu2 %vm363_vm10, %v355_v4 }
  0x32   : > { %541 = vmatpush.msra.mxu1 %v1050_v61 }
  0x33   : > { %763 = vmatmul.msk.f32.vlgmr.msra.gmra.mxu1 %vm363_vm10, %v494_v62 }
  0x36   : > { %758 = vmatmul.msk.f32.gmra.mxu3 %vm363_vm10, %v358_v63  ;;  %748 = vmatmul.msk.f32.gmra.mxu0 %vm363_vm10, %v348_v0 }
  0x38   : > { %756 = vmatmul.msk.f32.gmra.mxu2 %vm363_vm10, %v356_v8 }
  0x3b   : > { %764 = vmatmul.msk.f32.gmra.mxu1 %vm363_vm10, %v495_v1 }
  0x3e   : > { %759 = vmatmul.msk.f32.gmra.mxu3 %vm363_vm10, %v359_v2  ;;  %749 = vmatmul.msk.f32.gmra.mxu0 %vm363_vm10, %v349_v3 }
  0x43   : > { %765 = vmatmul.msk.f32.gmra.mxu1 %vm363_vm10, %v496_v5 }
  0x46   : > { %760 = vmatmul.msk.f32.gmra.mxu3 %vm363_vm10, %v360_v6  ;;  %750 = vmatmul.msk.f32.gmra.mxu0 %vm363_vm10, %v350_v7  ;;  %v567_v7 = vld [vmem:[%s1221_s4] sm:$0xf] }
  0x4b   : > { %766 = vmatmul.msk.f32.gmra.mxu1 %vm363_vm10, %v497_v9 }
  0x4e   : > { %761 = vmatmul.msk.f32.gmra.mxu3 %vm363_vm10, %v361_v10  ;;  %751 = vmatmul.msk.f32.gmra.mxu0 %vm363_vm10, %v351_v11 }
  0x53   : > { %767 = vmatmul.msk.f32.gmra.mxu1 %vm363_vm10, %v498_v12 }
  0x56   : > { %762 = vmatmul.msk.f32.gmra.mxu3 %vm363_vm10, %v362_v13  ;;  %752 = vmatmul.msk.f32.gmra.mxu0 %vm363_vm10, %v352_v14 }
  0x5b   : > { %768 = vmatmul.msk.f32.gmra.mxu1 %vm363_vm10, %v499_v15 }
  0x5e   : > { %753 = vmatmul.msk.f32.gmra.mxu0 %vm363_vm10, %v353_v16 }
  0x63   : > { %769 = vmatmul.msk.f32.gmra.mxu1 %vm363_vm10, %v500_v17 }
  0x66   : > { %754 = vmatmul.msk.f32.gmra.mxu0 %vm363_vm10, %v354_v18 }
  0x6b   : > { %770 = vmatmul.msk.f32.gmra.mxu1 %vm363_vm10, %v501_v19 }
  0xab   : > { %v1144_v20 = vpop.f32.mrf.mxu0 }
  0xac   : > { %v478_v8 = vmul.f32 %v1144_v20, %v1050_v61 }
  0xb0   : > { %v543_v21 = vpop.f32.mrf.mxu1 }
  0xb1   : > { %v1147_v22 = vmul.f32 %v543_v21, %v1028_v45  ;;  %v459_v23 = vpop.f32.mrf.mxu3 }
  0xb2   : > { %v488_v50 = vmul.f32 %v459_v23, %v1028_v45 }
  0xb3   : > { %v432_v24 = vpop.f32.mrf.mxu0  ;;  %v453_v37 = vpop.f32.mrf.mxu2 }
  0xb4   : > { %v486_v53 = vmul.f32 %v453_v37, %v1050_v61  ;;  %v479_v6 = vmul.f32 %v432_v24, %v1048_v60 }
  0xb8   : > { %v546_v25 = vpop.f32.mrf.mxu1 }
  0xb9   : > { %v462_v26 = vpop.f32.mrf.mxu3  ;;  %v569_v5 = vmul.f32 %v546_v25, %v1034_v48 }
  0xba   : > { %v489_v49 = vmul.f32 %v462_v26, %v1034_v48 }
  0xbb   : > { %v435_v27 = vpop.f32.mrf.mxu0  ;;  %v456_v47 = vpop.f32.mrf.mxu2 }
  0xbc   : > { %v487_v51 = vmul.f32 %v456_v47, %v1048_v60  ;;  %v480_v4 = vmul.f32 %v435_v27, %v1028_v45 }
  0xc0   : > { %v549_v28 = vpop.f32.mrf.mxu1 }
  0xc1   : > { %v465_v29 = vpop.f32.mrf.mxu3  ;;  %v570_v3 = vmul.f32 %v549_v28, %v1028_v45 }
  0xc2   : > { %v490_v44 = vmul.f32 %v465_v29, %v1050_v61 }
  0xc3   : > { %v438_v30 = vpop.f32.mrf.mxu0 }
  0xc4   : > { %v481_v2 = vmul.f32 %v438_v30, %v1034_v48 }
  0xc8   : > { %v552_v31 = vpop.f32.mrf.mxu1 }
  0xc9   : > { %v468_v32 = vpop.f32.mrf.mxu3  ;;  %v571_v1 = vmul.f32 %v552_v31, %v1034_v48 }
  0xca   : > { %v491_v43 = vmul.f32 %v468_v32, %v1048_v60 }
  0xcb   : > { %v441_v33 = vpop.f32.mrf.mxu0 }
  0xcc   : > { %v482_v0 = vmul.f32 %v441_v33, %v1050_v61 }
  0xd0   : > { %v555_v34 = vpop.f32.mrf.mxu1 }
  0xd1   : > { %v471_v35 = vpop.f32.mrf.mxu3  ;;  %v572_v63 = vmul.f32 %v555_v34, %v1028_v45 }
  0xd2   : > { %v492_v42 = vmul.f32 %v471_v35, %v1028_v45 }
  0xd3   : > { %v444_v36 = vpop.f32.mrf.mxu0 }
  0xd4   : > { %v483_v62 = vmul.f32 %v444_v36, %v1048_v60 }
  0xd8   : > { %v558_v38 = vpop.f32.mrf.mxu1 }
  0xd9   : > { %v474_v39 = vpop.f32.mrf.mxu3  ;;  %v573_v59 = vmul.f32 %v558_v38, %v1034_v48 }
  0xda   : > { %v493_v40 = vmul.f32 %v474_v39, %v1034_v48 }
  0xdb   : > { %v447_v41 = vpop.f32.mrf.mxu0 }
  0xdc   : > { %600 = vmatpush.msrb.mxu3 %v493_v40  ;;  %v484_v58 = vmul.f32 %v447_v41, %v1028_v45 }
  0xde   : > { %601 = vmatpush.msrb.mxu3 %v492_v42 }
  0xe0   : > { %v561_v46 = vpop.f32.mrf.mxu1  ;;  %602 = vmatpush.msrb.mxu3 %v491_v43 }
  0xe1   : > { %v574_v57 = vmul.f32 %v561_v46, %v1028_v45  ;;  %v477_v45 = vld [vmem:[%s1220_s3] sm:$0xf] }
  0xe2   : > { %603 = vmatpush.msrb.mxu3 %v490_v44 }
  0xe3   : > { %v450_v52 = vpop.f32.mrf.mxu0 }
  0xe4   : > { %604 = vmatpush.msrb.mxu3 %v489_v49  ;;  %v485_v55 = vmul.f32 %v450_v52, %v1034_v48 }
  0xe6   : > { %605 = vmatpush.msrb.mxu3 %v488_v50 }
  0xe8   : > { %v564_v54 = vpop.f32.mrf.mxu1  ;;  %606 = vmatpush.msrb.mxu3 %v487_v51 }
  0xe9   : > { %v575_v56 = vmul.f32 %v564_v54, %v1034_v48 }
  0xea   : > { %607 = vmatpush.msrb.mxu3 %v486_v53 }
  0xeb   : > { %588 = vmatpush.msrb.mxu2 %v575_v56 }
  0xec   : > { %608 = vmatpush.msrb.mxu3 %v485_v55 }
  0xed   : > { %589 = vmatpush.msrb.mxu2 %v574_v57 }
  0xee   : > { %609 = vmatpush.msrb.mxu3 %v484_v58 }
  0xef   : > { %590 = vmatpush.msrb.mxu2 %v573_v59 }
  0xf0   : > { %610 = vmatpush.msrb.mxu3 %v483_v62 }
  0xf1   : > { %591 = vmatpush.msrb.mxu2 %v572_v63 }
  0xf2   : > { %611 = vmatpush.msrb.mxu3 %v482_v0 }
  0xf3   : > { %592 = vmatpush.msrb.mxu2 %v571_v1 }
  0xf4   : > { %612 = vmatpush.msrb.mxu3 %v481_v2 }
  0xf5   : > { %593 = vmatpush.msrb.mxu2 %v570_v3 }
  0xf6   : > { %613 = vmatpush.msrb.mxu3 %v480_v4 }
  0xf7   : > { %594 = vmatpush.msrb.mxu2 %v569_v5 }
  0xf8   : > { %614 = vmatpush.msrb.mxu3 %v479_v6 }
  0xf9   : > { %595 = vmatpush.msrb.mxu2 %v1147_v22 }
  0xfa   : > { %615 = vmatpush.msrb.mxu3 %v478_v8  ;;  %771 = vmatmul.msk.f32.vlgmr.msrb.gmra.mxu2 %vm576_vm13, %v567_v7 }
  0xfb   : > { %616 = vmatmul.f32.vlgmr.msrb.gmra.mxu3 %v477_v45 }
 0x17d   : > { %v597_v48 = vpop.f32.mrf.mxu2 }
 0x17e   : > { %v617_v60 = vpop.f32.mrf.mxu3 }
 0x17f   : > { %v618_v61 = vadd.f32 %v617_v60, %v597_v48 }
 0x181   : > { %620 = vst [vmem:[%s261_s10] sm:$0xf] %v618_v61 }
 0x182   : > { %868 = shalt.err (!%p865_p5)
}
 0x183   : > { %786 = dma.vmem_to_hbm [thread:$0]  (%p991_p4), %s637_s11, 64, %s639_s12, %s622_s13  }
 0x184 PF: > { %p792_p6 = scmp.ge.s32.totalorder %s919_s23, 2  ;;  %s650_s25 = sand.u32 1, %s899_s18  }
 0x185   : > { %s651_s29 = scalar_lea.sflag [#allocation3], %s650_s25 }
 0x186   : > { %p789_p7 = pnand %p792_p6, %p998_p8 }
 0x188   : > { %p790_p9 = pneg %p789_p7 }
 0x18a   : > { %894 = dma.done.wait (%p790_p9), %s651_s29, 64  }
 0x18b   : > { %896 = vsyncadd (%p790_p9), %s651_s29, 4294967232  ;;  %s18_s23 = sadd.s32 1, %s919_s23   ;;  %s1231_s18 = smov %s903_s19 }
 0x18c   : > { %p15_p10 = scmp.ge.s32.totalorder %s18_s23, 4   ;;  %s1232_s19 = smov %s907_s20 }
 0x18d   : > { %s1233_s20 = smov %s1004_s6  ;;  %s1234_s21 = smov %s915_s22 }
 0x18e   : > { %s1235_s22 = smov %s1237_s26  ;;  %17 = sbr.rel (!%p15_p10) target bundleno = 4 (0x4), region = 81 }
 0x193   :  { %657 = vsyncpa [#allocation3], 1 }
 0x194   :  { %659 = vsyncpa [#allocation3 + $0x1], 1 }

// kernel: tpu_custom_call.1
= control target key start
LH: loop header
LB: loop body
LE: loop exit
PB: predicated region body
PF: predicated region fallthrough
CT: control target
= control target key end

     0   :  { %10 = vsyncpa [#allocation3], 0  ;;  %s1217_s0 = inlined_call_operand.vmem [shape: f32[3,256], index: 0, kind: input, shape index: {}]   ;;  %s1218_s1 = inlined_call_operand.vmem [shape: f32[128,16], index: 1, kind: input, shape index: {}]   ;;  %s1219_s2 = inlined_call_operand.vmem [shape: f32[64,16], index: 2, kind: input, shape index: {}]   ;;  %s1220_s3 = inlined_call_operand.vmem [shape: f32[4,128], index: 3, kind: input, shape index: {}]   ;;  %s1221_s4 = inlined_call_operand.vmem [shape: f32[4,64], index: 4, kind: input, shape index: {}]   ;;  %s1222_s5 = inlined_call_operand.hbm [shape: f32[4,256], index: 5, kind: output, shape index: {}]  }
   0x1   :  { %12 = vsyncpa [#allocation3 + $0x1], 0  ;;  %s951_s18 = smov 0   ;;  %s953_s19 = smov 0  }
   0x2   :  { %s955_s20 = smov 0   ;;  %s957_s21 = smov 0  }
   0x3   :  { %s959_s22 = smov 0   ;;  %s961_s23 = smov 0  }
   0x4 LB: > { %s738_s24 = sadd.s32 4294967295, %s919_s23   ;;  %s739_s25 = sadd.s32 4294967294, %s919_s23   ;;  %s919_s23 = sphi %s961_s23, %s18_s23   ;;  %s915_s22 = sphi %s959_s22, %s1235_s22   ;;  %s911_s21 = sphi %s957_s21, %s1234_s21   ;;  %s907_s20 = sphi %s955_s20, %s1233_s20   ;;  %s903_s19 = sphi %s953_s19, %s1232_s19   ;;  %s899_s18 = sphi %s951_s18, %s1231_s18  }
   0x5   : > { %s27_s26 = sadd.s32 1, %s915_s22  ;;  %s159_s27 = sadd.s32 1, %s907_s20 }
   0x6   : > { %p28_p0 = scmp.ge.s32.totalorder %s27_s26, 2  ;;  %p169_p1 = scmp.ne.s32.totalorder %s907_s20, %s903_s19 }
   0x7   : > { %p170_p2 = scmp.eq.s32.totalorder %s738_s24, 1  ;;  %p175_p3 = scmp.ne.s32.totalorder %s903_s19, %s899_s18 }
   0x8   : > { %s1237_s26 = smov (%p28_p0, %s27_s26), 0  ;;  %p176_p5 = scmp.eq.s32.totalorder %s739_s25, 1 }
   0x9   : > { %p991_p4 = por %p170_p2, %p169_p1  ;;  %s155_s29 = ssub.s32 %s915_s22, %s1237_s26 }
   0xa   : > { %p744_p6 = scmp.ge.s32.totalorder %s919_s23, 1  ;;  %p157_p7 = scmp.eq.s32.totalorder %s155_s29, 0 }
   0xb   : > { %p998_p8 = por %p176_p5, %p175_p3  ;;  %p225_p9 = scmp.lt.s32.totalorder %s919_s23, 3 }
   0xc   : > { %s1004_s6 = scalar_select %p157_p7, %s907_s20, %s159_s27  }
   0xd   : > { %p226_p10 = pnand %p744_p6, %p225_p9 }
   0xe   : > { %p262_p11 = scmp.lt.s32.totalorder (!%p226_p10), %s911_s21, 1  ;;  %s259_s25 = sand.u32 (!%p226_p10), 1, %s903_s19  }
   0xf   : > { %229 = sbr.rel (%p226_p10) target bundleno = 388 (0x184), region = 40  ;;  %s745_s27 = sshll.u32 (!%p226_p10), %s259_s25, 2 }
  0x10   : > { %s773_s29 = sshll.u32 (!%p226_p10), %s911_s21, 2  ;;  %s261_s10 = scalar_lea.vmem (!%p226_p10), [#allocation2], %s745_s27 }
  0x11   : > { %s634_s9 = scalar_lea.hbm (!%p226_p10), %s1222_s5, %s773_s29  ;;  %s622_s13 = scalar_lea.sflag (!%p226_p10), [#allocation3], %s259_s25 }
  0x12   : > { %s638_s12 = sshll.u32 (!%p226_p10), %s634_s9, 4  ;;  %s861_s17 = scalar_lea.hbm (!%p226_p10), %s1222_s5, 8  ;;  %s639_s12 = int_to_ptr.hbm [resolvable:$true] %s638_s12 }
  0x13   : > { %s855_s14 = sshra.s32 (!%p226_p10), %s639_s12, 4  ;;  %s856_s14 = int_to_ptr.hbm [resolvable:$true] %s855_s14 }
  0x14   : > { %s263_s7 = scalar_select %p262_p11, %s911_s21, 1  ;;  %v287_v0 = vlaneseq  ;;  %v357_v56 = vld [vmem:[%s1218_s1 + $0x50] sm:$0xff]  ;;  %vm363_vm10 = vcmask 130048   ;;  %v347_v57 = vld [vmem:[%s1218_s1] sm:$0xff]  ;;  %v358_v63 = vld [vmem:[%s1218_s1 + $0x58] sm:$0xff]  ;;  %vm576_vm13 = vcmask 523264  }
  0x15   : > { %v494_v62 = vld [vmem:[%s1219_s2] sm:$0xff]  ;;  %s857_s15 = scalar_lea.hbm %s856_s14, 4  ;;  %p862_p1 = scmp.lt.s32.totalorder %s856_s14, %s1222_s5 }
  0x16   : > { %s746_s8 = sshll.u32 %s263_s7, 2  ;;  %v1011_v7 = vshrl.u32 %v287_v0, 7  ;;  %v348_v0 = vld [vmem:[%s1218_s1 + $0x8] sm:$0xff]  ;;  %p858_p12 = scmp.ne.s32.totalorder %s856_s14, %s857_s15 }
  0x17   : > { %s265_s11 = scalar_lea.vmem %s1217_s0, %s746_s8  ;;  %p863_p2 = scmp.lt.s32.totalorder %s861_s17, %s857_s15 }
  0x18   : > { %v278_v1 = vld [vmem:[%s265_s11] sm:$0x1]  ;;  %v279_v2 = vld [vmem:[%s265_s11 + $0x1] sm:$0x1]  ;;  %v280_v3 = vld [vmem:[%s265_s11 + $0x2] sm:$0x1]  ;;  %p859_p13 = pnand %p858_p12, %p991_p4 }
  0x19   : > { %v281_v4 = vadd.f32 1.0, %v278_v1  ;;  %v305_v5 = vadd.f32 1.0, %v279_v2  ;;  %v326_v6 = vadd.f32 1.0, %v280_v3  ;;  %v289_v14 = vadd.s32 8, %v1011_v7  ;;  %v495_v1 = vld [vmem:[%s1219_s2 + $0x8] sm:$0xff]  ;;  %v359_v2 = vld [vmem:[%s1218_s1 + $0x60] sm:$0xff]  ;;  %p864_p3 = por %p863_p2, %p862_p1 }
  0x1a   : > { %v349_v3 = vld [vmem:[%s1218_s1 + $0x10] sm:$0xff]  ;;  %s636_s11 = sshll.u32 %s261_s10, 4  ;;  %p860_p0 = pneg %p859_p13  ;;  %s637_s11 = int_to_ptr.vmem [resolvable:$true] %s636_s11 }
  0x1b   : > { %v282_v8 = vmul.f32 7.5, %v281_v4  ;;  %v306_v9 = vmul.f32 7.5, %v305_v5  ;;  %v327_v10 = vmul.f32 7.5, %v326_v6  ;;  %v355_v4 = vld [vmem:[%s1218_s1 + $0x40] sm:$0xff]  ;;  %v496_v5 = vld [vmem:[%s1219_s2 + $0x10] sm:$0xff]  ;;  %v360_v6 = vld [vmem:[%s1218_s1 + $0x68] sm:$0xff] }
  0x1c   : > { %p865_p5 = pnand %p864_p3, %p860_p0 }
  0x1d   : > { %v283_v11 = vfloor.f32 %v282_v8  ;;  %v328_v12 = vfloor.f32 %v327_v10  ;;  %v307_v13 = vfloor.f32 %v306_v9 }
  0x1f   : > { %v284_v15 = vsub.f32 %v282_v8, %v283_v11  ;;  %v781_v16 = vcvt.f32.s32 %v283_v11  ;;  %v329_v17 = vsub.f32 %v327_v10, %v328_v12  ;;  %v785_v18 = vcvt.f32.s32 %v328_v12  ;;  %v356_v8 = vld [vmem:[%s1218_s1 + $0x48] sm:$0xff]  ;;  %v361_v10 = vld [vmem:[%s1218_s1 + $0x70] sm:$0xff]  ;;  %v351_v11 = vld [vmem:[%s1218_s1 + $0x20] sm:$0xff] }
  0x20   : > { %v308_v19 = vsub.f32 %v306_v9, %v307_v13  ;;  %v783_v20 = vcvt.f32.s32 %v307_v13  ;;  %v497_v9 = vld [vmem:[%s1219_s2 + $0x18] sm:$0xff]  ;;  %v498_v12 = vld [vmem:[%s1219_s2 + $0x20] sm:$0xff] }
  0x21   : > { %v285_v21 = vsub.f32 1.0, %v284_v15  ;;  %v290_v22 = vperm.slane %v781_v16, 0  ;;  %v296_v23 = vadd.s32 1, %v781_v16  ;;  %v300_v24 = vperm.slane %v284_v15, 0  ;;  %v362_v13 = vld [vmem:[%s1218_s1 + $0x78] sm:$0xff]  ;;  %v499_v15 = vld [vmem:[%s1219_s2 + $0x28] sm:$0xff] }
  0x22   : > { %v330_v25 = vsub.f32 1.0, %v329_v17  ;;  %v332_v26 = vperm.slane %v785_v18, 0  ;;  %v338_v27 = vadd.s32 1, %v785_v18  ;;  %v342_v28 = vperm.slane %v329_v17, 0  ;;  %v353_v16 = vld [vmem:[%s1218_s1 + $0x30] sm:$0xff]  ;;  %v354_v18 = vld [vmem:[%s1218_s1 + $0x38] sm:$0xff] }
  0x23   : > { %vm292_vm0 = vcmp.eq.s32.totalorder %v289_v14, %v290_v22  ;;  %v293_v29 = vperm.slane %v285_v21, 0  ;;  %v297_v30 = vperm.slane %v296_v23, 0  ;;  %v309_v31 = vsub.f32 1.0, %v308_v19  ;;  %v500_v17 = vld [vmem:[%s1219_s2 + $0x30] sm:$0xff] }
  0x24   : > { %vm1015_vm1 = vcmp.eq.s32.totalorder %v1011_v7, %v332_v26  ;;  %vm1019_vm2 = vcmp.eq.s32.totalorder %v289_v14, %v332_v26  ;;  %v335_v34 = vperm.slane %v330_v25, 0  ;;  %v339_v35 = vperm.slane %v338_v27, 0 }
  0x25   : > { %v295_v36 = vsel %vm292_vm0, %v293_v29, 0.0  ;;  %vm299_vm3 = vcmp.eq.s32.totalorder %v289_v14, %v297_v30  ;;  %v311_v37 = vperm.slane %v783_v20, 0  ;;  %v314_v43 = vperm.slane %v309_v31, 0 }
  0x26   : > { %v302_v38 = vsel %vm299_vm3, %v300_v24, 0.0  ;;  %v336_v39 = vsel %vm1015_vm1, %v335_v34, 0.0  ;;  %v337_v40 = vsel %vm1019_vm2, %v335_v34, 0.0  ;;  %vm340_vm4 = vcmp.eq.s32.totalorder %v1011_v7, %v339_v35 }
  0x27   : > { %v304_v41 = vadd.f32 %v302_v38, %v295_v36  ;;  %vm341_vm5 = vcmp.eq.s32.totalorder %v289_v14, %v339_v35  ;;  %v343_v42 = vsel %vm340_vm4, %v342_v28, 0.0  ;;  %vm1030_vm6 = vcmp.eq.s32.totalorder %v289_v14, %v311_v37 }
  0x28   : > { %v344_v44 = vsel %vm341_vm5, %v342_v28, 0.0  ;;  %v1028_v45 = vadd.f32 %v343_v42, %v336_v39  ;;  %v317_v47 = vadd.s32 1, %v783_v20  ;;  %v321_v49 = vperm.slane %v308_v19, 0  ;;  %v501_v19 = vld [vmem:[%s1219_s2 + $0x38] sm:$0xff] }
  0x29   : > { %v1034_v48 = vadd.f32 %v344_v44, %v337_v40  ;;  %777 = vmatpush.msra.mxu3 %v304_v41  ;;  %vm291_vm7 = vcmp.eq.s32.totalorder %v1011_v7, %v290_v22  ;;  %vm298_vm8 = vcmp.eq.s32.totalorder %v1011_v7, %v297_v30  ;;  %426 = vmatpush.msra.mxu0 %v304_v41  ;;  %v316_v53 = vsel %vm1030_vm6, %v314_v43, 0.0 }
  0x2a   : > { %v318_v50 = vperm.slane %v317_v47, 0  ;;  %v294_v51 = vsel %vm291_vm7, %v293_v29, 0.0  ;;  %v301_v52 = vsel %vm298_vm8, %v300_v24, 0.0  ;;  %vm312_vm9 = vcmp.eq.s32.totalorder %v1011_v7, %v311_v37  ;;  %776 = vmatpush.msra.mxu2 %v304_v41 }
  0x2b   : > { %v303_v54 = vadd.f32 %v301_v52, %v294_v51  ;;  %v315_v55 = vsel %vm312_vm9, %v314_v43, 0.0 }
  0x2c   : > { %vm320_vm11 = vcmp.eq.s32.totalorder %v289_v14, %v318_v50  ;;  %vm319_vm12 = vcmp.eq.s32.totalorder %v1011_v7, %v318_v50  ;;  %v350_v7 = vld [vmem:[%s1218_s1 + $0x18] sm:$0xff]  ;;  %v352_v14 = vld [vmem:[%s1218_s1 + $0x28] sm:$0xff] }
  0x2d   : > { %v323_v58 = vsel %vm320_vm11, %v321_v49, 0.0  ;;  %779 = vmatpush.msra.mxu3 %v303_v54  ;;  %v322_v59 = vsel %vm319_vm12, %v321_v49, 0.0  ;;  %427 = vmatpush.msra.mxu0 %v303_v54 }
  0x2e   : > { %v1048_v60 = vadd.f32 %v323_v58, %v316_v53  ;;  %v1050_v61 = vadd.f32 %v322_v59, %v315_v55  ;;  %757 = vmatmul.msk.f32.vlgmr.msra.gmra.mxu3 %vm363_vm10, %v357_v56  ;;  %747 = vmatmul.msk.f32.vlgmr.msra.gmra.mxu0 %vm363_vm10, %v347_v57 }
  0x2f   : > { %778 = vmatpush.msra.mxu2 %v303_v54 }
  0x30   : > { %540 = vmatpush.msra.mxu1 %v1048_v60  ;;  %755 = vmatmul.msk.f32.vlgmr.msra.gmra.mxu2 %vm363_vm10, %v355_v4 }
  0x32   : > { %541 = vmatpush.msra.mxu1 %v1050_v61 }
  0x33   : > { %763 = vmatmul.msk.f32.vlgmr.msra.gmra.mxu1 %vm363_vm10, %v494_v62 }
  0x36   : > { %758 = vmatmul.msk.f32.gmra.mxu3 %vm363_vm10, %v358_v63  ;;  %748 = vmatmul.msk.f32.gmra.mxu0 %vm363_vm10, %v348_v0 }
  0x38   : > { %756 = vmatmul.msk.f32.gmra.mxu2 %vm363_vm10, %v356_v8 }
  0x3b   : > { %764 = vmatmul.msk.f32.gmra.mxu1 %vm363_vm10, %v495_v1 }
  0x3e   : > { %759 = vmatmul.msk.f32.gmra.mxu3 %vm363_vm10, %v359_v2  ;;  %749 = vmatmul.msk.f32.gmra.mxu0 %vm363_vm10, %v349_v3 }
  0x43   : > { %765 = vmatmul.msk.f32.gmra.mxu1 %vm363_vm10, %v496_v5 }
  0x46   : > { %760 = vmatmul.msk.f32.gmra.mxu3 %vm363_vm10, %v360_v6  ;;  %750 = vmatmul.msk.f32.gmra.mxu0 %vm363_vm10, %v350_v7  ;;  %v567_v7 = vld [vmem:[%s1221_s4] sm:$0xf] }
  0x4b   : > { %766 = vmatmul.msk.f32.gmra.mxu1 %vm363_vm10, %v497_v9 }
  0x4e   : > { %761 = vmatmul.msk.f32.gmra.mxu3 %vm363_vm10, %v361_v10  ;;  %751 = vmatmul.msk.f32.gmra.mxu0 %vm363_vm10, %v351_v11 }
  0x53   : > { %767 = vmatmul.msk.f32.gmra.mxu1 %vm363_vm10, %v498_v12 }
  0x56   : > { %762 = vmatmul.msk.f32.gmra.mxu3 %vm363_vm10, %v362_v13  ;;  %752 = vmatmul.msk.f32.gmra.mxu0 %vm363_vm10, %v352_v14 }
  0x5b   : > { %768 = vmatmul.msk.f32.gmra.mxu1 %vm363_vm10, %v499_v15 }
  0x5e   : > { %753 = vmatmul.msk.f32.gmra.mxu0 %vm363_vm10, %v353_v16 }
  0x63   : > { %769 = vmatmul.msk.f32.gmra.mxu1 %vm363_vm10, %v500_v17 }
  0x66   : > { %754 = vmatmul.msk.f32.gmra.mxu0 %vm363_vm10, %v354_v18 }
  0x6b   : > { %770 = vmatmul.msk.f32.gmra.mxu1 %vm363_vm10, %v501_v19 }
  0xab   : > { %v1144_v20 = vpop.f32.mrf.mxu0 }
  0xac   : > { %v478_v8 = vmul.f32 %v1144_v20, %v1050_v61 }
  0xb0   : > { %v543_v21 = vpop.f32.mrf.mxu1 }
  0xb1   : > { %v1147_v22 = vmul.f32 %v543_v21, %v1028_v45  ;;  %v459_v23 = vpop.f32.mrf.mxu3 }
  0xb2   : > { %v488_v50 = vmul.f32 %v459_v23, %v1028_v45 }
  0xb3   : > { %v432_v24 = vpop.f32.mrf.mxu0  ;;  %v453_v37 = vpop.f32.mrf.mxu2 }
  0xb4   : > { %v486_v53 = vmul.f32 %v453_v37, %v1050_v61  ;;  %v479_v6 = vmul.f32 %v432_v24, %v1048_v60 }
  0xb8   : > { %v546_v25 = vpop.f32.mrf.mxu1 }
  0xb9   : > { %v462_v26 = vpop.f32.mrf.mxu3  ;;  %v569_v5 = vmul.f32 %v546_v25, %v1034_v48 }
  0xba   : > { %v489_v49 = vmul.f32 %v462_v26, %v1034_v48 }
  0xbb   : > { %v435_v27 = vpop.f32.mrf.mxu0  ;;  %v456_v47 = vpop.f32.mrf.mxu2 }
  0xbc   : > { %v487_v51 = vmul.f32 %v456_v47, %v1048_v60  ;;  %v480_v4 = vmul.f32 %v435_v27, %v1028_v45 }
  0xc0   : > { %v549_v28 = vpop.f32.mrf.mxu1 }
  0xc1   : > { %v465_v29 = vpop.f32.mrf.mxu3  ;;  %v570_v3 = vmul.f32 %v549_v28, %v1028_v45 }
  0xc2   : > { %v490_v44 = vmul.f32 %v465_v29, %v1050_v61 }
  0xc3   : > { %v438_v30 = vpop.f32.mrf.mxu0 }
  0xc4   : > { %v481_v2 = vmul.f32 %v438_v30, %v1034_v48 }
  0xc8   : > { %v552_v31 = vpop.f32.mrf.mxu1 }
  0xc9   : > { %v468_v32 = vpop.f32.mrf.mxu3  ;;  %v571_v1 = vmul.f32 %v552_v31, %v1034_v48 }
  0xca   : > { %v491_v43 = vmul.f32 %v468_v32, %v1048_v60 }
  0xcb   : > { %v441_v33 = vpop.f32.mrf.mxu0 }
  0xcc   : > { %v482_v0 = vmul.f32 %v441_v33, %v1050_v61 }
  0xd0   : > { %v555_v34 = vpop.f32.mrf.mxu1 }
  0xd1   : > { %v471_v35 = vpop.f32.mrf.mxu3  ;;  %v572_v63 = vmul.f32 %v555_v34, %v1028_v45 }
  0xd2   : > { %v492_v42 = vmul.f32 %v471_v35, %v1028_v45 }
  0xd3   : > { %v444_v36 = vpop.f32.mrf.mxu0 }
  0xd4   : > { %v483_v62 = vmul.f32 %v444_v36, %v1048_v60 }
  0xd8   : > { %v558_v38 = vpop.f32.mrf.mxu1 }
  0xd9   : > { %v474_v39 = vpop.f32.mrf.mxu3  ;;  %v573_v59 = vmul.f32 %v558_v38, %v1034_v48 }
  0xda   : > { %v493_v40 = vmul.f32 %v474_v39, %v1034_v48 }
  0xdb   : > { %v447_v41 = vpop.f32.mrf.mxu0 }
  0xdc   : > { %600 = vmatpush.msrb.mxu3 %v493_v40  ;;  %v484_v58 = vmul.f32 %v447_v41, %v1028_v45 }
  0xde   : > { %601 = vmatpush.msrb.mxu3 %v492_v42 }
  0xe0   : > { %v561_v46 = vpop.f32.mrf.mxu1  ;;  %602 = vmatpush.msrb.mxu3 %v491_v43 }
  0xe1   : > { %v574_v57 = vmul.f32 %v561_v46, %v1028_v45  ;;  %v477_v45 = vld [vmem:[%s1220_s3] sm:$0xf] }
  0xe2   : > { %603 = vmatpush.msrb.mxu3 %v490_v44 }
  0xe3   : > { %v450_v52 = vpop.f32.mrf.mxu0 }
  0xe4   : > { %604 = vmatpush.msrb.mxu3 %v489_v49  ;;  %v485_v55 = vmul.f32 %v450_v52, %v1034_v48 }
  0xe6   : > { %605 = vmatpush.msrb.mxu3 %v488_v50 }
  0xe8   : > { %v564_v54 = vpop.f32.mrf.mxu1  ;;  %606 = vmatpush.msrb.mxu3 %v487_v51 }
  0xe9   : > { %v575_v56 = vmul.f32 %v564_v54, %v1034_v48 }
  0xea   : > { %607 = vmatpush.msrb.mxu3 %v486_v53 }
  0xeb   : > { %588 = vmatpush.msrb.mxu2 %v575_v56 }
  0xec   : > { %608 = vmatpush.msrb.mxu3 %v485_v55 }
  0xed   : > { %589 = vmatpush.msrb.mxu2 %v574_v57 }
  0xee   : > { %609 = vmatpush.msrb.mxu3 %v484_v58 }
  0xef   : > { %590 = vmatpush.msrb.mxu2 %v573_v59 }
  0xf0   : > { %610 = vmatpush.msrb.mxu3 %v483_v62 }
  0xf1   : > { %591 = vmatpush.msrb.mxu2 %v572_v63 }
  0xf2   : > { %611 = vmatpush.msrb.mxu3 %v482_v0 }
  0xf3   : > { %592 = vmatpush.msrb.mxu2 %v571_v1 }
  0xf4   : > { %612 = vmatpush.msrb.mxu3 %v481_v2 }
  0xf5   : > { %593 = vmatpush.msrb.mxu2 %v570_v3 }
  0xf6   : > { %613 = vmatpush.msrb.mxu3 %v480_v4 }
  0xf7   : > { %594 = vmatpush.msrb.mxu2 %v569_v5 }
  0xf8   : > { %614 = vmatpush.msrb.mxu3 %v479_v6 }
  0xf9   : > { %595 = vmatpush.msrb.mxu2 %v1147_v22 }
  0xfa   : > { %615 = vmatpush.msrb.mxu3 %v478_v8  ;;  %771 = vmatmul.msk.f32.vlgmr.msrb.gmra.mxu2 %vm576_vm13, %v567_v7 }
  0xfb   : > { %616 = vmatmul.f32.vlgmr.msrb.gmra.mxu3 %v477_v45 }
 0x17d   : > { %v597_v48 = vpop.f32.mrf.mxu2 }
 0x17e   : > { %v617_v60 = vpop.f32.mrf.mxu3 }
 0x17f   : > { %v618_v61 = vadd.f32 %v617_v60, %v597_v48 }
 0x181   : > { %620 = vst [vmem:[%s261_s10] sm:$0xf] %v618_v61 }
 0x182   : > { %868 = shalt.err (!%p865_p5)
}
 0x183   : > { %786 = dma.vmem_to_hbm [thread:$0]  (%p991_p4), %s637_s11, 64, %s639_s12, %s622_s13  }
 0x184 PF: > { %p792_p6 = scmp.ge.s32.totalorder %s919_s23, 2  ;;  %s650_s25 = sand.u32 1, %s899_s18  }
 0x185   : > { %s651_s29 = scalar_lea.sflag [#allocation3], %s650_s25 }
 0x186   : > { %p789_p7 = pnand %p792_p6, %p998_p8 }
 0x188   : > { %p790_p9 = pneg %p789_p7 }
 0x18a   : > { %894 = dma.done.wait (%p790_p9), %s651_s29, 64  }
 0x18b   : > { %896 = vsyncadd (%p790_p9), %s651_s29, 4294967232  ;;  %s18_s23 = sadd.s32 1, %s919_s23   ;;  %s1231_s18 = smov %s903_s19 }
 0x18c   : > { %p15_p10 = scmp.ge.s32.totalorder %s18_s23, 4   ;;  %s1232_s19 = smov %s907_s20 }
 0x18d   : > { %s1233_s20 = smov %s1004_s6  ;;  %s1234_s21 = smov %s915_s22 }
 0x18e   : > { %s1235_s22 = smov %s1237_s26  ;;  %17 = sbr.rel (!%p15_p10) target bundleno = 4 (0x4), region = 81 }
 0x193   :  { %657 = vsyncpa [#allocation3], 1 }
 0x194   :  { %659 = vsyncpa [#allocation3 + $0x1], 1 }

</bundles_post_ra>
